<compile_context>
chip_gen: v6e
topology: v6e:2x2x1
jax: 0.10.0
libtpu: 0.0.40
codegen_flags: <defaults>
</compile_context>

<pallas_src>
import functools

import jax
import jax.numpy as jnp
from jax.experimental import pallas as pl
from jax.experimental.pallas import tpu as pltpu


def _round_up(x, m):
    return (x + m - 1) // m * m


# ---------------------------------------------------------------------------
# Kernel 1: hoisted input projection, tiled over rows of (Tp*Bp).
#   out[d, rows_tile] = x[d, rows_tile] @ wih[d] + b_fold[d]
# ---------------------------------------------------------------------------
def _input_proj_kernel(x_ref, wih_ref, b_ref, out_ref):
    out_ref[0] = (jnp.dot(x_ref[0], wih_ref[0],
                          preferred_element_type=jnp.float32)
                  + b_ref[0]).astype(out_ref.dtype)


# ---------------------------------------------------------------------------
# Kernel 2: fused forward/backward recurrence over one chunk of TC timesteps.
#   gi_ref:  (2, TC, Bp, 3Hp)  pre-gated inputs (biases folded, bwd pre-reversed)
#   whh_ref: (2, Hp, 3Hp)      hidden weights
#   bhn_ref: (2, 1, Hp)        b_hn (stays inside r * (...))
#   out_ref: (2, TC, Bp, Hp)
#   h_ref:   (2, Bp, Hp)       carried hidden state (VMEM scratch)
# ---------------------------------------------------------------------------
def _gru_recurrent_kernel(gi_ref, whh_ref, bhn_ref, out_ref, h_ref, *, unroll):
    c = pl.program_id(0)
    Hp = h_ref.shape[-1]
    TC = gi_ref.shape[1]

    @pl.when(c == 0)
    def _():
        # zero initial hidden state at the start of the sweep
        h_ref[...] = jnp.zeros_like(h_ref)

    # Invariant broadcasts hoisted out of the (partially unrolled) time loop;
    # JAX does not CSE broadcast_in_dim.
    bhn_f = jnp.broadcast_to(bhn_ref[0], h_ref.shape[1:])   # (Bp, Hp)
    bhn_b = jnp.broadcast_to(bhn_ref[1], h_ref.shape[1:])

    def cell(gi, h, whh, bhn):
        gh = jnp.dot(h, whh, preferred_element_type=jnp.float32)   # (Bp, 3Hp)
        r = jax.nn.sigmoid(gi[:, 0:Hp] + gh[:, 0:Hp])
        z = jax.nn.sigmoid(gi[:, Hp:2 * Hp] + gh[:, Hp:2 * Hp])
        n = jnp.tanh(gi[:, 2 * Hp:] + r * (gh[:, 2 * Hp:] + bhn))
        return (1.0 - z) * n + z * h

    def step(i, carry):
        # Two independent dependency chains (fwd / bwd) interleave in the
        # VLIW schedule and hide each other's MXU drain / EUP latency.
        h_f, h_b = carry
        h_f = cell(gi_ref[0, i], h_f, whh_ref[0], bhn_f)
        h_b = cell(gi_ref[1, i], h_b, whh_ref[1], bhn_b)
        out_ref[0, i] = h_f.astype(out_ref.dtype)
        out_ref[1, i] = h_b.astype(out_ref.dtype)
        return (h_f, h_b)

    # h is carried in vregs across the chunk; VMEM scratch touched only at the
    # chunk boundaries.
    h_f, h_b = jax.lax.fori_loop(0, TC, step, (h_ref[0], h_ref[1]),
                                 unroll=unroll)
    h_ref[0] = h_f
    h_ref[1] = h_b


def gru_block(x, wih, whh, bih, bhh):
    """Bidirectional GRU, batch_first, zero initial hidden state.

    x:   (B, T, D) float32
    wih: (2, D, 3H)  == PyTorch weight_ih_l0{,_reverse}.T, gate order [r|z|n]
    whh: (2, H, 3H)
    bih: (2, 1, 3H)
    bhh: (2, 1, 3H)
    returns: (B, T, 2H)  (forward hidden | backward hidden)
    """
    B, T, D = x.shape
    H = whh.shape[1]
    f32 = jnp.float32

    # ---- TPU-friendly padded sizes -----------------------------------------
    Hp = _round_up(H, 128)                    # lane-dense hidden dim
    Bp = _round_up(B, 8)                      # sublane-aligned batch
    TC = min(32, pl.next_power_of_2(T))       # timesteps per recurrent grid step
    Tp = _round_up(T, TC)
    n_chunks = Tp // TC
    Gp = 3 * Hp

    wih = wih.astype(f32); whh = whh.astype(f32)
    bih = bih.astype(f32); bhh = bhh.astype(f32)

    # Fold b_ih (all gates) plus b_hh (r, z gates) into the precomputed input
    # gates; only b_hn stays inside the recurrence (it sits inside r * (...)).
    b_fold = bih + jnp.concatenate(
        [bhh[..., :2 * H], jnp.zeros_like(bhh[..., 2 * H:])], axis=-1)  # (2,1,3H)

    def pad_gates_last(a):
        # (..., 3H) -> (..., 3Hp): zero-pad each gate block independently so
        # the [r|z|n] splits stay lane-aligned.
        a = a.reshape(a.shape[:-1] + (3, H))
        a = jnp.pad(a, [(0, 0)] * (a.ndim - 1) + [(0, Hp - H)])
        return a.reshape(a.shape[:-2] + (3 * Hp,))

    wih_p = pad_gates_last(wih)                                        # (2, D, 3Hp)
    b_fold_p = pad_gates_last(b_fold)                                  # (2, 1, 3Hp)
    whh_p = pad_gates_last(whh)                                        # (2, H, 3Hp)
    whh_p = jnp.pad(whh_p, ((0, 0), (0, Hp - H), (0, 0)))              # (2, Hp, 3Hp)
    bhn_p = jnp.pad(bhh[..., 2 * H:], ((0, 0), (0, 0), (0, Hp - H)))   # (2, 1, Hp)

    # Pre-reverse the backward direction in time so both directions walk the
    # chunks left->right with static per-step indices; padding (time & batch)
    # lands AFTER each direction's real steps, so padded steps can only
    # corrupt h after the last real output and never need masking.
    x_tbd = jnp.transpose(x, (1, 0, 2)).astype(f32)                    # (T, B, D)
    x2 = jnp.stack([x_tbd, x_tbd[::-1]], axis=0)                       # (2, T, B, D)
    x2 = jnp.pad(x2, ((0, 0), (0, Tp - T), (0, Bp - B), (0, 0)))       # (2, Tp, Bp, D)
    rows = Tp * Bp
    x2 = x2.reshape(2, rows, D)

    # ---- kernel 1: gi = x @ W_ih + b, tiled over rows -----------------------
    TM = min(rows, 512)
    TM -= TM % 8
    while rows % TM:
        TM -= 8

    gates = pl.pallas_call(
        _input_proj_kernel,
        out_shape=jax.ShapeDtypeStruct((2, rows, Gp), f32),
        grid_spec=pltpu.PrefetchScalarGridSpec(
            num_scalar_prefetch=0,
            grid=(2, rows // TM),
            in_specs=[
                pl.BlockSpec((1, TM, D), lambda d, m: (d, m, 0)),
                pl.BlockSpec((1, D, Gp), lambda d, m: (d, 0, 0)),
                pl.BlockSpec((1, 1, Gp), lambda d, m: (d, 0, 0)),
            ],
            out_specs=pl.BlockSpec((1, TM, Gp), lambda d, m: (d, m, 0)),
        ),
        compiler_params=pltpu.CompilerParams(
            dimension_semantics=("parallel", "parallel"),
            vmem_limit_bytes=32 * 1024 * 1024),
    )(x2, wih_p, b_fold_p)
    gates = gates.reshape(2, Tp, Bp, Gp)

    # ---- kernel 2: fused fwd/bwd recurrence over time chunks ----------------
    unroll = min(TC, 8)
    out = pl.pallas_call(
        functools.partial(_gru_recurrent_kernel, unroll=unroll),
        out_shape=jax.ShapeDtypeStruct((2, Tp, Bp, Hp), f32),
        grid_spec=pltpu.PrefetchScalarGridSpec(
            num_scalar_prefetch=0,
            grid=(n_chunks,),
            in_specs=[
                pl.BlockSpec((2, TC, Bp, Gp), lambda c: (0, c, 0, 0)),
                pl.BlockSpec((2, Hp, Gp), lambda c: (0, 0, 0)),
                pl.BlockSpec((2, 1, Hp), lambda c: (0, 0, 0)),
            ],
            out_specs=pl.BlockSpec((2, TC, Bp, Hp), lambda c: (0, c, 0, 0)),
            scratch_shapes=[pltpu.VMEM((2, Bp, Hp), f32)],
        ),
        compiler_params=pltpu.CompilerParams(
            # time axis carries h_ref and must remain sequential
            dimension_semantics=("arbitrary",),
            vmem_limit_bytes=32 * 1024 * 1024),
    )(gates, whh_p, bhn_p)

    # Strip padding, restore forward time order for the backward half, and
    # return PyTorch layout (B, T, 2H).
    # TODO(synk): consumers that accept (2, T, B, H) directly avoid this
    #             transpose's extra HBM round trip.
    out_f = out[0, :T, :B, :H]                    # (T, B, H)
    out_b = out[1, :T, :B, :H][::-1]              # un-reverse backward time
    res = jnp.concatenate([out_f, out_b], axis=-1)
    return jnp.transpose(res, (1, 0, 2))          # (B, T, 2H)


def gru_ref(x, wih, whh, bih, bhh):
    """Pure-JAX reference (same math) used only for a correctness check."""
    B, T, D = x.shape
    H = whh.shape[1]

    def run_dir(d, xs):
        def step(h, x_t):
            gi = x_t @ wih[d] + bih[d, 0]
            gh = h @ whh[d] + bhh[d, 0]
            r = jax.nn.sigmoid(gi[:, :H] + gh[:, :H])
            z = jax.nn.sigmoid(gi[:, H:2 * H] + gh[:, H:2 * H])
            n = jnp.tanh(gi[:, 2 * H:] + r * gh[:, 2 * H:])
            h_new = (1.0 - z) * n + z * h
            return h_new, h_new

        h0 = jnp.zeros((B, H), jnp.float32)
        _, ys = jax.lax.scan(step, h0, xs)
        return ys  # (T, B, H)

    x_tbd = jnp.transpose(x, (1, 0, 2))
    fwd = run_dir(0, x_tbd)
    bwd = run_dir(1, x_tbd[::-1])[::-1]
    return jnp.concatenate(
        [jnp.transpose(fwd, (1, 0, 2)), jnp.transpose(bwd, (1, 0, 2))], axis=-1)


if __name__ == "__main__":
    B, T, D, H = 2, 8, 4, 32  # batch, seq, input_dim, hidden_dim

    key = jax.random.PRNGKey(0)
    kx, kwih, kwhh, kbih, kbhh = jax.random.split(key, 5)
    bound = 1.0 / float(jnp.sqrt(H))  # PyTorch nn.GRU uniform init bound

    x = jax.random.normal(kx, (B, T, D), jnp.float32)
    wih = jax.random.uniform(kwih, (2, D, 3 * H), jnp.float32, -bound, bound)
    whh = jax.random.uniform(kwhh, (2, H, 3 * H), jnp.float32, -bound, bound)
    bih = jax.random.uniform(kbih, (2, 1, 3 * H), jnp.float32, -bound, bound)
    bhh = jax.random.uniform(kbhh, (2, 1, 3 * H), jnp.float32, -bound, bound)

    out = jax.block_until_ready(gru_block(x, wih, whh, bih, bhh))
    assert out.shape == (B, T, 2 * H), out.shape

    ref = gru_ref(x, wih, whh, bih, bhh)
    assert jnp.allclose(out, ref, atol=1e-5, rtol=1e-5), float(
        jnp.max(jnp.abs(out - ref)))

    print("KERNEL_OK")
</pallas_src>

<mosaic_0001>
module attributes {stable_mosaic.version = 11 : i64} {
  func.func @_input_proj_kernel(%arg0: i32, %arg1: i32, %arg2: memref<1x64x4xf32, #tpu.memory_space<vmem>>, %arg3: memref<1x4x384xf32, #tpu.memory_space<vmem>>, %arg4: memref<1x1x384xf32, #tpu.memory_space<vmem>>, %arg5: memref<1x64x384xf32, #tpu.memory_space<vmem>>) attributes {dimension_semantics = [#tpu.dimension_semantics<parallel>, #tpu.dimension_semantics<parallel>], iteration_bounds = array<i64: 2, 1>, scalar_prefetch = 0 : i64, scratch_operands = 0 : i64, tpu.core_type = #tpu.core_type<tc>, window_params = [{transform_indices = @transform_0, window_bounds = array<i64: 1, 64, 4>}, {transform_indices = @transform_1, window_bounds = array<i64: 1, 4, 384>}, {transform_indices = @transform_2, window_bounds = array<i64: 1, 1, 384>}, {transform_indices = @transform_3, window_bounds = array<i64: 1, 64, 384>}]} {
    %c0 = arith.constant 0 : index
    %c0_0 = arith.constant 0 : index
    %c0_1 = arith.constant 0 : index
    %0 = vector.load %arg2[%c0, %c0_0, %c0_1] : memref<1x64x4xf32, #tpu.memory_space<vmem>>, vector<1x64x4xf32>
    %1 = vector.shape_cast %0 : vector<1x64x4xf32> to vector<64x4xf32>
    %c0_2 = arith.constant 0 : index
    %c0_3 = arith.constant 0 : index
    %c0_4 = arith.constant 0 : index
    %2 = vector.load %arg3[%c0_2, %c0_3, %c0_4] : memref<1x4x384xf32, #tpu.memory_space<vmem>>, vector<1x4x384xf32>
    %3 = vector.shape_cast %2 : vector<1x4x384xf32> to vector<4x384xf32>
    %cst = arith.constant dense<0.000000e+00> : vector<64x384xf32>
    %4 = tpu.matmul %1, %3, %cst {dimension_numbers = #tpu.dot_dimension_numbers<[1], [0], [0], [1], [0, 0, 1, 1], [], []>} : vector<64x4xf32>, vector<4x384xf32>, vector<64x384xf32> -> vector<64x384xf32>
    %c0_5 = arith.constant 0 : index
    %c0_6 = arith.constant 0 : index
    %c0_7 = arith.constant 0 : index
    %5 = vector.load %arg4[%c0_5, %c0_6, %c0_7] : memref<1x1x384xf32, #tpu.memory_space<vmem>>, vector<1x1x384xf32>
    %6 = vector.shape_cast %5 : vector<1x1x384xf32> to vector<1x384xf32>
    %7 = vector.broadcast %6 : vector<1x384xf32> to vector<64x384xf32>
    %8 = arith.addf %4, %7 : vector<64x384xf32>
    %c0_8 = arith.constant 0 : index
    %c0_9 = arith.constant 0 : index
    %c0_10 = arith.constant 0 : index
    %9 = vector.load %arg5[%c0_8, %c0_9, %c0_10] : memref<1x64x384xf32, #tpu.memory_space<vmem>>, vector<1x64x384xf32>
    %10 = vector.shape_cast %9 : vector<1x64x384xf32> to vector<64x384xf32>
    %11 = vector.shape_cast %8 : vector<64x384xf32> to vector<1x64x384xf32>
    tpu.vector_store %arg5[%c0_8, %c0_9, %c0_10], %11 {strides = array<i32>} : memref<1x64x384xf32, #tpu.memory_space<vmem>>, vector<1x64x384xf32>,
    return
  }
  func.func @transform_0(%arg0: i32, %arg1: i32) -> (i32, i32, i32) {
    %c0_i32 = arith.constant 0 : i32
    %c0_i32_0 = arith.constant 0 : i32
    return %arg0, %arg1, %c0_i32 : i32, i32, i32
  }
  func.func @transform_1(%arg0: i32, %arg1: i32) -> (i32, i32, i32) {
    %c0_i32 = arith.constant 0 : i32
    %c0_i32_0 = arith.constant 0 : i32
    %c0_i32_1 = arith.constant 0 : i32
    return %arg0, %c0_i32, %c0_i32_0 : i32, i32, i32
  }
  func.func @transform_2(%arg0: i32, %arg1: i32) -> (i32, i32, i32) {
    %c0_i32 = arith.constant 0 : i32
    %c0_i32_0 = arith.constant 0 : i32
    %c0_i32_1 = arith.constant 0 : i32
    return %arg0, %c0_i32, %c0_i32_0 : i32, i32, i32
  }
  func.func @transform_3(%arg0: i32, %arg1: i32) -> (i32, i32, i32) {
    %c0_i32 = arith.constant 0 : i32
    %c0_i32_0 = arith.constant 0 : i32
    return %arg0, %arg1, %c0_i32 : i32, i32, i32
  }
}

</mosaic_0001>

<bundles_post_ra>
// kernel: tpu_custom_call.1
= control target key start
LH: loop header
LB: loop body
LE: loop exit
PB: predicated region body
PF: predicated region fallthrough
CT: control target
= control target key end

     0   :  { %8 = vsyncpa [#allocation3], 0  ;;  %s1090_s0 = inlined_call_operand.vmem [shape: f32[2,64,4], index: 0, kind: input, shape index: {}]   ;;  %s1091_s1 = inlined_call_operand.vmem [shape: f32[2,4,384], index: 1, kind: input, shape index: {}]   ;;  %s1092_s2 = inlined_call_operand.vmem [shape: f32[2,1,384], index: 2, kind: input, shape index: {}]   ;;  %s1093_s3 = inlined_call_operand.hbm [shape: f32[2,64,384], index: 3, kind: output, shape index: {}]  }
   0x1   :  { %10 = vsyncpa [#allocation3 + $0x1], 0  ;;  %s882_s12 = smov 0   ;;  %s884_s13 = smov 0  }
   0x2   :  { %s886_s14 = smov 0   ;;  %s888_s15 = smov 0  }
   0x3   :  { %s890_s16 = smov 0   ;;  %s892_s17 = smov 0  }
   0x4 LB: > { %s661_s18 = sadd.s32 4294967295, %s856_s17   ;;  %s662_s19 = sadd.s32 4294967294, %s856_s17   ;;  %s856_s17 = sphi %s892_s17, %s16_s17   ;;  %s852_s16 = sphi %s890_s16, %s1100_s16   ;;  %s848_s15 = sphi %s888_s15, %s1099_s15   ;;  %s844_s14 = sphi %s886_s14, %s1098_s14   ;;  %s840_s13 = sphi %s884_s13, %s1097_s13   ;;  %s836_s12 = sphi %s882_s12, %s1096_s12  }
   0x5   : > { %s28_s20 = sadd.s32 1, %s852_s16  ;;  %s117_s21 = sadd.s32 1, %s844_s14 }
   0x6   : > { %p30_p0 = scmp.ge.s32.totalorder %s28_s20, 2  ;;  %p127_p1 = scmp.ne.s32.totalorder %s844_s14, %s840_s13 }
   0x7   : > { %p128_p2 = scmp.eq.s32.totalorder %s661_s18, 1  ;;  %p133_p3 = scmp.ne.s32.totalorder %s840_s13, %s836_s12 }
   0x8   : > { %s1102_s20 = smov (%p30_p0, %s28_s20), 0  ;;  %p134_p5 = scmp.eq.s32.totalorder %s662_s19, 1 }
   0x9   : > { %p922_p4 = por %p128_p2, %p127_p1  ;;  %s112_s23 = ssub.s32 %s852_s16, %s1102_s20 }
   0xa   : > { %p665_p6 = scmp.ge.s32.totalorder %s856_s17, 1  ;;  %p115_p7 = scmp.eq.s32.totalorder %s112_s23, 0 }
   0xb   : > { %p929_p8 = por %p134_p5, %p133_p3  ;;  %p180_p9 = scmp.lt.s32.totalorder %s856_s17, 3 }
   0xc   : > { %s935_s25 = scalar_select %p115_p7, %s844_s14, %s117_s21  }
   0xd   : > { %p181_p10 = pnand %p665_p6, %p180_p9 }
   0xe   : > { %p218_p11 = scmp.lt.s32.totalorder (!%p181_p10), %s848_s15, 1  ;;  %s214_s18 = sand.u32 (!%p181_p10), 1, %s840_s13  }
   0xf   : > { %184 = sbr.rel (%p181_p10) target bundleno = 261 (0x105), region = 32  ;;  %s1045_s29 = scalar_lea.sflag (!%p181_p10), [#allocation3], %s214_s18 }
  0x10   : > { %s717_s19 = smul.u32 (!%p181_p10), 192, %s214_s18 }
  0x11   : > { %s720_s23 = smul.u32 (!%p181_p10), 3072, %s848_s15 }
  0x12   : > { %s994_s21 = scalar_lea.vmem (!%p181_p10), [#allocation2], %s717_s19 }
  0x14   : > { %v858_v0 = vmov 0.0   ;;  %s939_s26 = scalar_select %p218_p11, %s848_s15, 1  ;;  %vm292_vm0 = vcmask 1043456   ;;  %vm267_vm1 = vcmask 31744   ;;  %v249_v12 = vlaneseq }
  0x15   : > { %363 = vmatprep.mubr.f32.mxu0 %v858_v0  ;;  %399 = vmatprep.mubr.f32.mxu1 %v858_v0 }
  0x16   : > { %s691_s27 = sshll.u32 %s939_s26, 6  ;;  %s718_s28 = smul.u32 12, %s939_s26  ;;  %v250_v13 = vshrl.u32 %v249_v12, 7 }
  0x17   : > { %s946_s4 = scalar_lea.vmem %s1090_s0, %s691_s27  ;;  %s719_s8 = smul.u32 3, %s939_s26 }
  0x18   : > { %s231_s7 = scalar_lea.vmem %s1091_s1, %s718_s28  ;;  %v237_v3 = vld [vmem:[%s946_s4] sm:$0xff]  ;;  %v243_v4 = vld [vmem:[%s946_s4 + $0x30] sm:$0xff]  ;;  %v238_v6 = vld [vmem:[%s946_s4 + $0x8] sm:$0xff]  ;;  %v251_v14 = vsub.s32 0, %v250_v13  ;;  %v255_v16 = vsub.s32 1, %v250_v13  ;;  %v259_v21 = vsub.s32 2, %v250_v13  ;;  %s1034_s28 = scalar_lea.hbm %s1093_s3, %s720_s23 }
  0x19   : > { %v245_v1 = vld [vmem:[%s231_s7] sm:$0xff]  ;;  %v246_v5 = vld [vmem:[%s231_s7 + $0x8] sm:$0xf]  ;;  %v244_v7 = vld [vmem:[%s946_s4 + $0x38] sm:$0xff]  ;;  %s235_s11 = scalar_lea.vmem %s1092_s2, %s719_s8  ;;  %s558_s26 = sshll.u32 %s994_s21, 4  ;;  %s1036_s26 = int_to_ptr.vmem [resolvable:$true] %s558_s26 }
  0x1a   : > { %v266_v2 = vcombine.high %v245_v1, %v245_v1  ;;  %v239_v8 = vld [vmem:[%s946_s4 + $0x10] sm:$0xff]  ;;  %v240_v9 = vld [vmem:[%s946_s4 + $0x18] sm:$0xff]  ;;  %v241_v10 = vld [vmem:[%s946_s4 + $0x20] sm:$0xff]  ;;  %s780_s30 = scalar_lea.vmem %s1036_s26, 3072 }
  0x1b   : > { %v242_v11 = vld [vmem:[%s946_s4 + $0x28] sm:$0xff]  ;;  %v247_v15 = vld [vmem:[%s235_s11] sm:$0x7]  ;;  %p781_p12 = scmp.ne.s32.totalorder %s1036_s26, %s780_s30  ;;  %s859_s4 = smov [#allocation2]  }
  0x1c   : > { %669 = vmatprep.subr.msk.mxu0 %vm292_vm0, %v266_v2  ;;  %715 = vmatprep.subr.msk.mxu1 %vm292_vm0, %v266_v2  ;;  %v988_v17 = vrot.slane %v247_v15, %v251_v14  ;;  %v990_v18 = vrot.slane %v247_v15, %v255_v16  ;;  %v260_v30 = vrot.slane %v247_v15, %v259_v21  ;;  %s784_s5 = sshll.u32 %s859_s4, 4  ;;  %s785_s5 = int_to_ptr.vmem [resolvable:$false] %s784_s5 }
  0x1d   : > { %670 = vmatpush1.msk.msra.mxu0 %vm292_vm0, %v245_v1  ;;  %716 = vmatpush1.msk.msra.mxu1 %vm292_vm0, %v245_v1  ;;  %p782_p13 = pnand %p781_p12, %p922_p4  ;;  %s786_s6 = scalar_lea.vmem %s785_s5, 6144 }
  0x1e   : > { %671 = vmatmul.mubr.msk.f32.vlgmr.msra.gmra.mxu0 %vm267_vm1, %v237_v3  ;;  %677 = vmatmul.mubr.msk.f32.vlgmr.msra.gmra.mxu1 %vm267_vm1, %v243_v4  ;;  %p787_p1 = scmp.lt.s32.totalorder %s1036_s26, %s785_s5  ;;  %p788_p2 = scmp.lt.s32.totalorder %s786_s6, %s780_s30 }
  0x1f   : > { %701 = vmatprep.subr.msk.mxu1 %vm292_vm0, %v246_v5  ;;  %369 = vmatprep.mubr.f32.mxu0 %v858_v0  ;;  %p783_p0 = pneg %p782_p13 }
  0x20   : > { %702 = vmatpush3.msk.msra.mxu1 %vm292_vm0, %v246_v5  ;;  %405 = vmatprep.mubr.f32.mxu1 %v858_v0  ;;  %p789_p3 = por %p788_p2, %p787_p1 }
  0x22   : > { %672 = vmatmul.mubr.msk.f32.gmra.mxu0 %vm267_vm1, %v238_v6  ;;  %678 = vmatmul.mubr.msk.f32.gmra.mxu1 %vm267_vm1, %v244_v7  ;;  %p790_p5 = pnand %p789_p3, %p783_p0 }
  0x23   : > { %375 = vmatprep.mubr.f32.mxu0 %v858_v0  ;;  %703 = vmatprep.mubr.msk.f32.mxu1 %vm267_vm1, %v237_v3 }
  0x26   : > { %673 = vmatmul.mubr.msk.f32.gmra.mxu0 %vm267_vm1, %v239_v8  ;;  %704 = vmatmul.mubr.msk.f32.vlgmr.msra.gmra.mxu1 %vm267_vm1, %v238_v6 }
  0x27   : > { %381 = vmatprep.mubr.f32.mxu0 %v858_v0  ;;  %706 = vmatprep.mubr.msk.f32.mxu1 %vm267_vm1, %v239_v8 }
  0x2a   : > { %674 = vmatmul.mubr.msk.f32.gmra.mxu0 %vm267_vm1, %v240_v9  ;;  %707 = vmatmul.mubr.msk.f32.gmra.mxu1 %vm267_vm1, %v240_v9 }
  0x2b   : > { %387 = vmatprep.mubr.f32.mxu0 %v858_v0  ;;  %709 = vmatprep.mubr.msk.f32.mxu1 %vm267_vm1, %v241_v10 }
  0x2e   : > { %675 = vmatmul.mubr.msk.f32.gmra.mxu0 %vm267_vm1, %v241_v10  ;;  %710 = vmatmul.mubr.msk.f32.gmra.mxu1 %vm267_vm1, %v242_v11 }
  0x2f   : > { %393 = vmatprep.mubr.f32.mxu0 %v858_v0  ;;  %712 = vmatprep.mubr.msk.f32.mxu1 %vm267_vm1, %v243_v4 }
  0x32   : > { %676 = vmatmul.mubr.msk.f32.gmra.mxu0 %vm267_vm1, %v242_v11  ;;  %713 = vmatmul.mubr.msk.f32.gmra.mxu1 %vm267_vm1, %v244_v7 }
  0xde   : > { %v365_v19 = vpop.f32.mrf.mxu0  ;;  %v401_v20 = vpop.f32.mrf.mxu1 }
  0xdf   : > { %v366_v22 = vadd.f32 %v365_v19, %v988_v17  ;;  %v402_v23 = vadd.f32 %v401_v20, %v988_v17 }
  0xe0   : > { %v367_v24 = vpop.f32.mrf.mxu0  ;;  %v403_v25 = vpop.f32.mrf.mxu1 }
  0xe1   : > { %517 = vst [vmem:[%s994_s21] sm:$0xff] %v366_v22  ;;  %535 = vst [vmem:[%s994_s21 + $0x90] sm:$0xff] %v402_v23  ;;  %v368_v26 = vadd.f32 %v367_v24, %v990_v18  ;;  %v404_v27 = vadd.f32 %v403_v25, %v990_v18 }
  0xe2   : > { %v371_v28 = vpop.f32.mrf.mxu0  ;;  %v407_v29 = vpop.f32.mrf.mxu1 }
  0xe3   : > { %518 = vst [vmem:[%s994_s21 + $0x8] sm:$0xff] %v368_v26  ;;  %536 = vst [vmem:[%s994_s21 + $0x98] sm:$0xff] %v404_v27  ;;  %v372_v31 = vadd.f32 %v371_v28, %v988_v17  ;;  %v408_v32 = vadd.f32 %v407_v29, %v988_v17 }
  0xe4   : > { %v373_v33 = vpop.f32.mrf.mxu0  ;;  %v409_v34 = vpop.f32.mrf.mxu1 }
  0xe5   : > { %520 = vst [vmem:[%s994_s21 + $0x18] sm:$0xff] %v372_v31  ;;  %538 = vst [vmem:[%s994_s21 + $0xa8] sm:$0xff] %v408_v32  ;;  %v374_v35 = vadd.f32 %v373_v33, %v990_v18  ;;  %v410_v36 = vadd.f32 %v409_v34, %v990_v18 }
  0xe6   : > { %v377_v37 = vpop.f32.mrf.mxu0  ;;  %v705_v38 = vpop.f32.mrf.mxu1 }
  0xe7   : > { %521 = vst [vmem:[%s994_s21 + $0x20] sm:$0xff] %v374_v35  ;;  %539 = vst [vmem:[%s994_s21 + $0xb0] sm:$0xff] %v410_v36  ;;  %v378_v39 = vadd.f32 %v377_v37, %v988_v17  ;;  %v484_v40 = vadd.f32 %v705_v38, %v260_v30 }
  0xe8   : > { %v379_v41 = vpop.f32.mrf.mxu0  ;;  %v478_v42 = vpop.f32.mrf.mxu1 }
  0xe9   : > { %523 = vst [vmem:[%s994_s21 + $0x30] sm:$0xff] %v378_v39  ;;  %522 = vst [vmem:[%s994_s21 + $0x28] sm:$0xff] %v484_v40  ;;  %v380_v43 = vadd.f32 %v379_v41, %v990_v18  ;;  %v479_v44 = vadd.f32 %v478_v42, %v260_v30 }
  0xea   : > { %v383_v45 = vpop.f32.mrf.mxu0  ;;  %v708_v46 = vpop.f32.mrf.mxu1 }
  0xeb   : > { %524 = vst [vmem:[%s994_s21 + $0x38] sm:$0xff] %v380_v43  ;;  %519 = vst [vmem:[%s994_s21 + $0x10] sm:$0xff] %v479_v44  ;;  %v384_v47 = vadd.f32 %v383_v45, %v988_v17  ;;  %v494_v48 = vadd.f32 %v708_v46, %v260_v30 }
  0xec   : > { %v385_v49 = vpop.f32.mrf.mxu0  ;;  %v488_v50 = vpop.f32.mrf.mxu1 }
  0xed   : > { %526 = vst [vmem:[%s994_s21 + $0x48] sm:$0xff] %v384_v47  ;;  %528 = vst [vmem:[%s994_s21 + $0x58] sm:$0xff] %v494_v48  ;;  %v386_v51 = vadd.f32 %v385_v49, %v990_v18  ;;  %v489_v52 = vadd.f32 %v488_v50, %v260_v30 }
  0xee   : > { %v389_v53 = vpop.f32.mrf.mxu0  ;;  %v711_v54 = vpop.f32.mrf.mxu1 }
  0xef   : > { %527 = vst [vmem:[%s994_s21 + $0x50] sm:$0xff] %v386_v51  ;;  %525 = vst [vmem:[%s994_s21 + $0x40] sm:$0xff] %v489_v52  ;;  %v390_v55 = vadd.f32 %v389_v53, %v988_v17  ;;  %v504_v56 = vadd.f32 %v711_v54, %v260_v30 }
  0xf0   : > { %v391_v57 = vpop.f32.mrf.mxu0  ;;  %v498_v58 = vpop.f32.mrf.mxu1 }
  0xf1   : > { %529 = vst [vmem:[%s994_s21 + $0x60] sm:$0xff] %v390_v55  ;;  %534 = vst [vmem:[%s994_s21 + $0x88] sm:$0xff] %v504_v56  ;;  %v392_v59 = vadd.f32 %v391_v57, %v990_v18  ;;  %v499_v60 = vadd.f32 %v498_v58, %v260_v30 }
  0xf2   : > { %v395_v61 = vpop.f32.mrf.mxu0  ;;  %v714_v62 = vpop.f32.mrf.mxu1 }
  0xf3   : > { %530 = vst [vmem:[%s994_s21 + $0x68] sm:$0xff] %v392_v59  ;;  %531 = vst [vmem:[%s994_s21 + $0x70] sm:$0xff] %v499_v60  ;;  %v396_v63 = vadd.f32 %v395_v61, %v988_v17  ;;  %v514_v0 = vadd.f32 %v714_v62, %v260_v30 }
  0xf4   : > { %v397_v1 = vpop.f32.mrf.mxu0  ;;  %v508_v2 = vpop.f32.mrf.mxu1 }
  0xf5   : > { %532 = vst [vmem:[%s994_s21 + $0x78] sm:$0xff] %v396_v63  ;;  %540 = vst [vmem:[%s994_s21 + $0xb8] sm:$0xff] %v514_v0  ;;  %v398_v3 = vadd.f32 %v397_v1, %v990_v18  ;;  %v509_v4 = vadd.f32 %v508_v2, %v260_v30 }
  0xf7   : > { %533 = vst [vmem:[%s994_s21 + $0x80] sm:$0xff] %v398_v3  ;;  %537 = vst [vmem:[%s994_s21 + $0xa0] sm:$0xff] %v509_v4 }
  0xf8   : > { %793 = shalt.err (!%p790_p5)
}
  0xf9   : > { %s794_s7 = scalar_lea.hbm %s1034_s28, 3072  ;;  %s798_s10 = scalar_lea.hbm %s1093_s3, 6144 }
  0xfa   : > { %p795_p6 = scmp.ne.s32.totalorder %s1034_s28, %s794_s7  ;;  %p799_p10 = scmp.lt.s32.totalorder %s1034_s28, %s1093_s3 }
  0xfb   : > { %p800_p11 = scmp.lt.s32.totalorder %s798_s10, %s794_s7 }
  0xfc   : > { %p796_p7 = pnand %p795_p6, %p922_p4 }
  0xfd   : > { %p801_p12 = por %p800_p11, %p799_p10 }
  0xfe   : > { %p797_p9 = pneg %p796_p7 }
 0x100   : > { %p802_p13 = pnand %p801_p12, %p797_p9 }
 0x102   : > { %805 = shalt.err (!%p802_p13)
}
 0x103   : > { %s860_s19 = smov 384   ;;  %s861_s21 = smov 24  }
 0x104   : > { %721 = dma.vmem_to_hbm [thread:$0]  (%p922_p4), %s1036_s26, 3072, %s1034_s28, %s1045_s29, %s860_s19, %s860_s19, %s861_s21  }
 0x105 PF: > { %p727_p0 = scmp.ge.s32.totalorder %s856_s17, 2  ;;  %s573_s23 = sand.u32 1, %s836_s12  }
 0x106   : > { %s574_s15 = scalar_lea.sflag [#allocation3], %s573_s23 }
 0x107   : > { %p724_p1 = pnand %p727_p0, %p929_p8 }
 0x109   : > { %p725_p2 = pneg %p724_p1 }
 0x10b   : > { %831 = dma.done.wait (%p725_p2), %s574_s15, 3072  }
 0x10c   : > { %833 = vsyncadd (%p725_p2), %s574_s15, 4294964224  ;;  %s16_s17 = sadd.s32 1, %s856_s17   ;;  %s1096_s12 = smov %s840_s13 }
 0x10d   : > { %p13_p3 = scmp.ge.s32.totalorder %s16_s17, 4   ;;  %s1097_s13 = smov %s844_s14 }
 0x10e   : > { %s1098_s14 = smov %s935_s25  ;;  %s1099_s15 = smov %s852_s16 }
 0x10f   : > { %s1100_s16 = smov %s1102_s20  ;;  %15 = sbr.rel (!%p13_p3) target bundleno = 4 (0x4), region = 73 }
 0x114   :  { %579 = vsyncpa [#allocation3], 1 }
 0x115   :  { %581 = vsyncpa [#allocation3 + $0x1], 1 }

</bundles_post_ra>
